<compile_context>
chip_gen: v7x
topology: tpu7x:2x2x1
jax: 0.10.0
libtpu: 0.0.40
codegen_flags: <defaults>
</compile_context>

<pallas_src>
import jax
import jax.numpy as jnp
from jax import lax
from jax.experimental import pallas as pl
from jax.experimental.pallas import tpu as pltpu


def _make_bpnn_kernel(compute_dtype):
    """Build the fused kernel; `compute_dtype` is the bias/tanh elementwise dtype."""

    def bpnn_kernel(x_ref,
                    w1_ref, b1_ref,
                    w2_ref, b2_ref,
                    w3_ref, b3_ref,
                    w4_ref, b4_ref,
                    w5_ref, b5_ref,
                    o_ref):
        """Fused forward pass on one batch tile.

        x_ref      : (bt, num) f32        -- native layout, batch on sublanes
        w{1..4}_ref: (out, in) bf16       -- torch layout, pre-scaled by 0.5
        b{1..4}_ref: (out, 1)  compute_dtype, pre-scaled by 0.5
        w5_ref     : (64, 1) f32, b5_ref: (1, 1) f32 -- pre-scaled by 0.5
        o_ref      : (1, bt) f32          -- batch on lanes (lane-dense store)
        """

        def act(y_f32, b_ref):
            # sigmoid(2*t) = 0.5*tanh(t) + 0.5; the 0.5 pre-scale already lives
            # in the halved weights/biases.  One EUP transcendental per element.
            y = y_f32.astype(compute_dtype) + b_ref[...]
            return (0.5 * jnp.tanh(y) + 0.5).astype(jnp.bfloat16)

        # Layer 1: contract the feature dim of BOTH operands (A @ B^T, the
        # flash-attention NT pattern), so x is used in its native layout and no
        # transpose is materialized.  Result lands transposed: (64, bt).
        x_bf16 = x_ref[...].astype(jnp.bfloat16)                       # (bt, num)
        h = act(
            lax.dot_general(w1_ref[...], x_bf16, (((1,), (1,)), ((), ())),
                            preferred_element_type=jnp.float32),       # (64, bt)
            b1_ref)

        # Layers 2-4: standard (out,in) @ (in,bt) MXU matmuls with f32
        # accumulation; bf16 hand-off between layers keeps vreg pressure low.
        h = act(jnp.dot(w2_ref[...], h, preferred_element_type=jnp.float32), b2_ref)
        h = act(jnp.dot(w3_ref[...], h, preferred_element_type=jnp.float32), b3_ref)
        h = act(jnp.dot(w4_ref[...], h, preferred_element_type=jnp.float32), b4_ref)

        # Layer 5 (64 -> 1): VPU multiply + sublane reduce in f32; the result is
        # already the lane-dense (1, bt) output block (batch on lanes).
        y5 = jnp.sum(h.astype(jnp.float32) * w5_ref[...], axis=0, keepdims=True)
        y5 = y5 + b5_ref[...]
        o_ref[...] = (0.5 * jnp.tanh(y5) + 0.5).astype(o_ref.dtype)

    return bpnn_kernel


def _chip_config():
    """(elementwise compute dtype, max batch tile) for the local TPU generation."""
    try:
        kind = jax.devices()[0].device_kind.lower()
    except Exception:
        kind = ""
    if ("v6" in kind) or ("v7" in kind) or ("7x" in kind) or ("trillium" in kind):
        # Native bf16 VPU/EUP -> bf16 bias+tanh; VMEM is ample -> big tiles.
        return jnp.bfloat16, 4096
    # v5e and older: no bf16 VPU/EUP (keep elementwise math in f32) and only one
    # vector-store slot -> cap the tile so f32 spills stay off the store slot.
    return jnp.float32, 512


def _pick_batch_tile(B, max_tile):
    # Largest lane-dense tile (multiple of 128) that divides B and leaves
    # >= 2 grid steps; prefer an even step count so a 2-TC chip (v7x) can split
    # the "parallel" axis across both TensorCores.  Fall back to the whole batch
    # for small/odd B (single step; masked lane stores if B < 128).
    cands = [t for t in (4096, 2048, 1024, 512, 256, 128) if t <= max_tile]
    for require_even in (True, False):
        for bt in cands:
            if B % bt:
                continue
            steps = B // bt
            if steps >= 2 and (not require_even or steps % 2 == 0):
                return bt
    return B


def bpnn_forward(x, params, *, batch_tile=None):
    """x: [B, num] float32.  params: torch-layout w1..w5 ([out,in]), b1..b5 ([out])."""
    B, num = x.shape
    compute_dtype, max_tile = _chip_config()
    if batch_tile is None:
        batch_tile = _pick_batch_tile(B, max_tile)
    assert B % batch_tile == 0
    assert batch_tile == B or batch_tile % 128 == 0, (
        "batch_tile must be lane-dense (multiple of 128) or cover the whole batch")

    x = jnp.asarray(x, jnp.float32)                   # native [B, num] layout

    # Fold the sigmoid pre-scale into the parameters (0.5*W, 0.5*b).  0.5 is a
    # power of two, so the bf16 cast is exactly as accurate as the unscaled one.
    def prep_w(w):                                    # (out, in) -> bf16, halved
        return (0.5 * jnp.asarray(w, jnp.float32)).astype(jnp.bfloat16)

    def prep_b(b):                                    # (out,) -> (out, 1), halved
        return (0.5 * jnp.asarray(b, jnp.float32)).astype(compute_dtype).reshape(-1, 1)

    w1, w2, w3, w4 = (prep_w(params[f"w{i}"]) for i in range(1, 5))
    b1, b2, b3, b4 = (prep_b(params[f"b{i}"]) for i in range(1, 5))
    w5 = (0.5 * jnp.asarray(params["w5"], jnp.float32)).reshape(-1, 1)   # (64, 1) f32
    b5 = (0.5 * jnp.asarray(params["b5"], jnp.float32)).reshape(1, 1)    # (1, 1)  f32

    def full_spec(arr):
        # Full-array block, resident / replicated across the batch grid.
        # TODO(synk): pipeline_mode=pl.Buffered(1) would drop the redundant
        # double-buffering of these grid-invariant operands; kept at the default
        # to stay on the well-trodden lowering path.
        return pl.BlockSpec(arr.shape, lambda i: (0, 0))

    grid = (B // batch_tile,)

    # Advisory cost estimate so XLA schedules this custom call sensibly.
    dims = [(num, 64), (64, 128), (128, 128), (128, 64), (64, 1)]
    flops = 2 * B * sum(i * o for i, o in dims)
    transcendentals = B * sum(o for _, o in dims)
    bytes_accessed = (B * num * 4 + B * 4
                      + sum(int(params[f"w{i}"].size) for i in range(1, 6)) * 2
                      + sum(int(params[f"b{i}"].size) for i in range(1, 6)) * 4)

    out = pl.pallas_call(
        _make_bpnn_kernel(compute_dtype),
        out_shape=jax.ShapeDtypeStruct((1, B), jnp.float32),
        grid_spec=pltpu.PrefetchScalarGridSpec(
            num_scalar_prefetch=0,
            grid=grid,
            in_specs=[
                pl.BlockSpec((batch_tile, num), lambda i: (i, 0)),   # x, native layout
                full_spec(w1), full_spec(b1),
                full_spec(w2), full_spec(b2),
                full_spec(w3), full_spec(b3),
                full_spec(w4), full_spec(b4),
                full_spec(w5), full_spec(b5),
            ],
            out_specs=pl.BlockSpec((1, batch_tile), lambda i: (0, i)),
        ),
        compiler_params=pltpu.CompilerParams(
            dimension_semantics=("parallel",)),
        cost_estimate=pl.CostEstimate(
            flops=flops,
            transcendentals=transcendentals,
            bytes_accessed=bytes_accessed),
    )(x, w1, b1, w2, b2, w3, b3, w4, b4, w5, b5)

    return out.reshape(B, 1)                          # back to [batch, 1]


def init_params(key, num):
    """Deterministic init matching torch.nn.Linear (weights stored [out, in])."""
    dims = [(num, 64), (64, 128), (128, 128), (128, 64), (64, 1)]
    params = {}
    for idx, (fan_in, fan_out) in enumerate(dims, start=1):
        key, kw, kb = jax.random.split(key, 3)
        bound = 1.0 / jnp.sqrt(fan_in)
        params[f"w{idx}"] = jax.random.uniform(
            kw, (fan_out, fan_in), jnp.float32, -bound, bound)
        params[f"b{idx}"] = jax.random.uniform(
            kb, (fan_out,), jnp.float32, -bound, bound)
    return params


def bpnn_reference(x, params):
    """Pure-JAX f32 reference for correctness check."""
    h = x
    for i in range(1, 6):
        h = jax.nn.sigmoid(h @ params[f"w{i}"].T + params[f"b{i}"])
    return h


if __name__ == "__main__":
    key = jax.random.PRNGKey(0)
    num = 32           # input feature size (the `num` arg of BPNN)
    batch = 256        # small, but enough for 2 lane-dense (128-row) grid steps

    k_x, k_p = jax.random.split(key)
    x = jax.random.normal(k_x, (batch, num), jnp.float32)
    params = init_params(k_p, num)

    out = bpnn_forward(x, params)
    out = jax.block_until_ready(out)

    ref = bpnn_reference(x, params)
    assert out.shape == (batch, 1)
    max_err = float(jnp.max(jnp.abs(out - ref)))
    # bf16 MXU inputs + bf16 activation carry -> looser tolerance than pure f32.
    assert jnp.allclose(out, ref, atol=3e-2, rtol=3e-2), \
        f"mismatch vs reference (max abs err {max_err})"

    print("KERNEL_OK")
</pallas_src>

<mosaic_0001>
module attributes {stable_mosaic.version = 11 : i64} {
  func.func @bpnn_kernel(%arg0: i32, %arg1: memref<128x32xf32, #tpu.memory_space<vmem>>, %arg2: memref<64x32xbf16, #tpu.memory_space<vmem>>, %arg3: memref<64x1xf32, #tpu.memory_space<vmem>>, %arg4: memref<128x64xbf16, #tpu.memory_space<vmem>>, %arg5: memref<128x1xf32, #tpu.memory_space<vmem>>, %arg6: memref<128x128xbf16, #tpu.memory_space<vmem>>, %arg7: memref<128x1xf32, #tpu.memory_space<vmem>>, %arg8: memref<64x128xbf16, #tpu.memory_space<vmem>>, %arg9: memref<64x1xf32, #tpu.memory_space<vmem>>, %arg10: memref<64x1xf32, #tpu.memory_space<vmem>>, %arg11: memref<1x1xf32, #tpu.memory_space<vmem>>, %arg12: memref<1x128xf32, #tpu.memory_space<vmem>>) attributes {dimension_semantics = [#tpu.dimension_semantics<parallel>], iteration_bounds = array<i64: 2>, scalar_prefetch = 0 : i64, scratch_operands = 0 : i64, tpu.core_type = #tpu.core_type<tc>, window_params = [{transform_indices = @transform_0, window_bounds = array<i64: 128, 32>}, {pipeline_mode = #tpu.pipeline_mode<synchronous>, transform_indices = @transform_1, window_bounds = array<i64: 64, 32>}, {pipeline_mode = #tpu.pipeline_mode<synchronous>, transform_indices = @transform_2, window_bounds = array<i64: 64, 1>}, {pipeline_mode = #tpu.pipeline_mode<synchronous>, transform_indices = @transform_3, window_bounds = array<i64: 128, 64>}, {pipeline_mode = #tpu.pipeline_mode<synchronous>, transform_indices = @transform_4, window_bounds = array<i64: 128, 1>}, {pipeline_mode = #tpu.pipeline_mode<synchronous>, transform_indices = @transform_5, window_bounds = array<i64: 128, 128>}, {pipeline_mode = #tpu.pipeline_mode<synchronous>, transform_indices = @transform_6, window_bounds = array<i64: 128, 1>}, {pipeline_mode = #tpu.pipeline_mode<synchronous>, transform_indices = @transform_7, window_bounds = array<i64: 64, 128>}, {pipeline_mode = #tpu.pipeline_mode<synchronous>, transform_indices = @transform_8, window_bounds = array<i64: 64, 1>}, {pipeline_mode = #tpu.pipeline_mode<synchronous>, transform_indices = @transform_9, window_bounds = array<i64: 64, 1>}, {pipeline_mode = #tpu.pipeline_mode<synchronous>, transform_indices = @transform_10, window_bounds = array<i64: 1, 1>}, {transform_indices = @transform_11, window_bounds = array<i64: 1, 128>}]} {
    %c0 = arith.constant 0 : index
    %c0_0 = arith.constant 0 : index
    %0 = vector.load %arg1[%c0, %c0_0] : memref<128x32xf32, #tpu.memory_space<vmem>>, vector<128x32xf32>
    %1 = arith.truncf %0 : vector<128x32xf32> to vector<128x32xbf16>
    %c0_1 = arith.constant 0 : index
    %c0_2 = arith.constant 0 : index
    %2 = vector.load %arg2[%c0_1, %c0_2] : memref<64x32xbf16, #tpu.memory_space<vmem>>, vector<64x32xbf16>
    %cst = arith.constant dense<0.000000e+00> : vector<64x128xf32>
    %3 = tpu.matmul %2, %1, %cst {dimension_numbers = #tpu.dot_dimension_numbers<[1], [1], [0], [0], [0, 0, 1, 0], [], []>} : vector<64x32xbf16>, vector<128x32xbf16>, vector<64x128xf32> -> vector<64x128xf32>
    %c0_3 = arith.constant 0 : index
    %c0_4 = arith.constant 0 : index
    %4 = vector.load %arg3[%c0_3, %c0_4] : memref<64x1xf32, #tpu.memory_space<vmem>>, vector<64x1xf32>
    %5 = vector.broadcast %4 : vector<64x1xf32> to vector<64x128xf32>
    %6 = arith.addf %3, %5 : vector<64x128xf32>
    %7 = math.tanh %6 : vector<64x128xf32>
    %cst_5 = arith.constant 5.000000e-01 : f32
    %8 = vector.broadcast %cst_5 : f32 to vector<64x128xf32>
    %9 = arith.mulf %8, %7 : vector<64x128xf32>
    %cst_6 = arith.constant 5.000000e-01 : f32
    %10 = vector.broadcast %cst_6 : f32 to vector<64x128xf32>
    %11 = arith.addf %9, %10 : vector<64x128xf32>
    %12 = arith.truncf %11 : vector<64x128xf32> to vector<64x128xbf16>
    %c0_7 = arith.constant 0 : index
    %c0_8 = arith.constant 0 : index
    %13 = vector.load %arg4[%c0_7, %c0_8] : memref<128x64xbf16, #tpu.memory_space<vmem>>, vector<128x64xbf16>
    %cst_9 = arith.constant dense<0.000000e+00> : vector<128x128xf32>
    %14 = tpu.matmul %13, %12, %cst_9 {dimension_numbers = #tpu.dot_dimension_numbers<[1], [0], [0], [1], [0, 0, 1, 1], [], []>} : vector<128x64xbf16>, vector<64x128xbf16>, vector<128x128xf32> -> vector<128x128xf32>
    %c0_10 = arith.constant 0 : index
    %c0_11 = arith.constant 0 : index
    %15 = vector.load %arg5[%c0_10, %c0_11] : memref<128x1xf32, #tpu.memory_space<vmem>>, vector<128x1xf32>
    %16 = vector.broadcast %15 : vector<128x1xf32> to vector<128x128xf32>
    %17 = arith.addf %14, %16 : vector<128x128xf32>
    %18 = math.tanh %17 : vector<128x128xf32>
    %cst_12 = arith.constant 5.000000e-01 : f32
    %19 = vector.broadcast %cst_12 : f32 to vector<128x128xf32>
    %20 = arith.mulf %19, %18 : vector<128x128xf32>
    %cst_13 = arith.constant 5.000000e-01 : f32
    %21 = vector.broadcast %cst_13 : f32 to vector<128x128xf32>
    %22 = arith.addf %20, %21 : vector<128x128xf32>
    %23 = arith.truncf %22 : vector<128x128xf32> to vector<128x128xbf16>
    %c0_14 = arith.constant 0 : index
    %c0_15 = arith.constant 0 : index
    %24 = vector.load %arg6[%c0_14, %c0_15] : memref<128x128xbf16, #tpu.memory_space<vmem>>, vector<128x128xbf16>
    %cst_16 = arith.constant dense<0.000000e+00> : vector<128x128xf32>
    %25 = tpu.matmul %24, %23, %cst_16 {dimension_numbers = #tpu.dot_dimension_numbers<[1], [0], [0], [1], [0, 0, 1, 1], [], []>} : vector<128x128xbf16>, vector<128x128xbf16>, vector<128x128xf32> -> vector<128x128xf32>
    %c0_17 = arith.constant 0 : index
    %c0_18 = arith.constant 0 : index
    %26 = vector.load %arg7[%c0_17, %c0_18] : memref<128x1xf32, #tpu.memory_space<vmem>>, vector<128x1xf32>
    %27 = vector.broadcast %26 : vector<128x1xf32> to vector<128x128xf32>
    %28 = arith.addf %25, %27 : vector<128x128xf32>
    %29 = math.tanh %28 : vector<128x128xf32>
    %cst_19 = arith.constant 5.000000e-01 : f32
    %30 = vector.broadcast %cst_19 : f32 to vector<128x128xf32>
    %31 = arith.mulf %30, %29 : vector<128x128xf32>
    %cst_20 = arith.constant 5.000000e-01 : f32
    %32 = vector.broadcast %cst_20 : f32 to vector<128x128xf32>
    %33 = arith.addf %31, %32 : vector<128x128xf32>
    %34 = arith.truncf %33 : vector<128x128xf32> to vector<128x128xbf16>
    %c0_21 = arith.constant 0 : index
    %c0_22 = arith.constant 0 : index
    %35 = vector.load %arg8[%c0_21, %c0_22] : memref<64x128xbf16, #tpu.memory_space<vmem>>, vector<64x128xbf16>
    %cst_23 = arith.constant dense<0.000000e+00> : vector<64x128xf32>
    %36 = tpu.matmul %35, %34, %cst_23 {dimension_numbers = #tpu.dot_dimension_numbers<[1], [0], [0], [1], [0, 0, 1, 1], [], []>} : vector<64x128xbf16>, vector<128x128xbf16>, vector<64x128xf32> -> vector<64x128xf32>
    %c0_24 = arith.constant 0 : index
    %c0_25 = arith.constant 0 : index
    %37 = vector.load %arg9[%c0_24, %c0_25] : memref<64x1xf32, #tpu.memory_space<vmem>>, vector<64x1xf32>
    %38 = vector.broadcast %37 : vector<64x1xf32> to vector<64x128xf32>
    %39 = arith.addf %36, %38 : vector<64x128xf32>
    %40 = math.tanh %39 : vector<64x128xf32>
    %cst_26 = arith.constant 5.000000e-01 : f32
    %41 = vector.broadcast %cst_26 : f32 to vector<64x128xf32>
    %42 = arith.mulf %41, %40 : vector<64x128xf32>
    %cst_27 = arith.constant 5.000000e-01 : f32
    %43 = vector.broadcast %cst_27 : f32 to vector<64x128xf32>
    %44 = arith.addf %42, %43 : vector<64x128xf32>
    %45 = arith.truncf %44 : vector<64x128xf32> to vector<64x128xbf16>
    %46 = arith.extf %45 : vector<64x128xbf16> to vector<64x128xf32>
    %c0_28 = arith.constant 0 : index
    %c0_29 = arith.constant 0 : index
    %47 = vector.load %arg10[%c0_28, %c0_29] : memref<64x1xf32, #tpu.memory_space<vmem>>, vector<64x1xf32>
    %48 = vector.broadcast %47 : vector<64x1xf32> to vector<64x128xf32>
    %49 = arith.mulf %46, %48 : vector<64x128xf32>
    %cst_30 = arith.constant dense<0.000000e+00> : vector<128xf32>
    %50 = vector.multi_reduction <add>, %49, %cst_30 [0] : vector<64x128xf32> to vector<128xf32>
    %51 = vector.shape_cast %50 : vector<128xf32> to vector<1x128xf32>
    %c0_31 = arith.constant 0 : index
    %c0_32 = arith.constant 0 : index
    %52 = vector.load %arg11[%c0_31, %c0_32] : memref<1x1xf32, #tpu.memory_space<vmem>>, vector<1x1xf32>
    %53 = vector.broadcast %52 : vector<1x1xf32> to vector<1x128xf32>
    %54 = arith.addf %51, %53 : vector<1x128xf32>
    %55 = math.tanh %54 : vector<1x128xf32>
    %cst_33 = arith.constant 5.000000e-01 : f32
    %56 = vector.broadcast %cst_33 : f32 to vector<1x128xf32>
    %57 = arith.mulf %56, %55 : vector<1x128xf32>
    %cst_34 = arith.constant 5.000000e-01 : f32
    %58 = vector.broadcast %cst_34 : f32 to vector<1x128xf32>
    %59 = arith.addf %57, %58 : vector<1x128xf32>
    %c0_35 = arith.constant 0 : index
    %c0_36 = arith.constant 0 : index
    %60 = vector.load %arg12[%c0_35, %c0_36] : memref<1x128xf32, #tpu.memory_space<vmem>>, vector<1x128xf32>
    tpu.vector_store %arg12[%c0_35, %c0_36], %59 {strides = array<i32>} : memref<1x128xf32, #tpu.memory_space<vmem>>, vector<1x128xf32>,
    return
  }
  func.func @transform_0(%arg0: i32) -> (i32, i32) {
    %c0_i32 = arith.constant 0 : i32
    %c0_i32_0 = arith.constant 0 : i32
    return %arg0, %c0_i32 : i32, i32
  }
  func.func @transform_1(%arg0: i32) -> (i32, i32) {
    %c0_i32 = arith.constant 0 : i32
    %c0_i32_0 = arith.constant 0 : i32
    %c0_i32_1 = arith.constant 0 : i32
    return %c0_i32, %c0_i32_0 : i32, i32
  }
  func.func @transform_2(%arg0: i32) -> (i32, i32) {
    %c0_i32 = arith.constant 0 : i32
    %c0_i32_0 = arith.constant 0 : i32
    %c0_i32_1 = arith.constant 0 : i32
    return %c0_i32, %c0_i32_0 : i32, i32
  }
  func.func @transform_3(%arg0: i32) -> (i32, i32) {
    %c0_i32 = arith.constant 0 : i32
    %c0_i32_0 = arith.constant 0 : i32
    %c0_i32_1 = arith.constant 0 : i32
    return %c0_i32, %c0_i32_0 : i32, i32
  }
  func.func @transform_4(%arg0: i32) -> (i32, i32) {
    %c0_i32 = arith.constant 0 : i32
    %c0_i32_0 = arith.constant 0 : i32
    %c0_i32_1 = arith.constant 0 : i32
    return %c0_i32, %c0_i32_0 : i32, i32
  }
  func.func @transform_5(%arg0: i32) -> (i32, i32) {
    %c0_i32 = arith.constant 0 : i32
    %c0_i32_0 = arith.constant 0 : i32
    %c0_i32_1 = arith.constant 0 : i32
    return %c0_i32, %c0_i32_0 : i32, i32
  }
  func.func @transform_6(%arg0: i32) -> (i32, i32) {
    %c0_i32 = arith.constant 0 : i32
    %c0_i32_0 = arith.constant 0 : i32
    %c0_i32_1 = arith.constant 0 : i32
    return %c0_i32, %c0_i32_0 : i32, i32
  }
  func.func @transform_7(%arg0: i32) -> (i32, i32) {
    %c0_i32 = arith.constant 0 : i32
    %c0_i32_0 = arith.constant 0 : i32
    %c0_i32_1 = arith.constant 0 : i32
    return %c0_i32, %c0_i32_0 : i32, i32
  }
  func.func @transform_8(%arg0: i32) -> (i32, i32) {
    %c0_i32 = arith.constant 0 : i32
    %c0_i32_0 = arith.constant 0 : i32
    %c0_i32_1 = arith.constant 0 : i32
    return %c0_i32, %c0_i32_0 : i32, i32
  }
  func.func @transform_9(%arg0: i32) -> (i32, i32) {
    %c0_i32 = arith.constant 0 : i32
    %c0_i32_0 = arith.constant 0 : i32
    %c0_i32_1 = arith.constant 0 : i32
    return %c0_i32, %c0_i32_0 : i32, i32
  }
  func.func @transform_10(%arg0: i32) -> (i32, i32) {
    %c0_i32 = arith.constant 0 : i32
    %c0_i32_0 = arith.constant 0 : i32
    %c0_i32_1 = arith.constant 0 : i32
    return %c0_i32, %c0_i32_0 : i32, i32
  }
  func.func @transform_11(%arg0: i32) -> (i32, i32) {
    %c0_i32 = arith.constant 0 : i32
    %c0_i32_0 = arith.constant 0 : i32
    return %c0_i32, %arg0 : i32, i32
  }
}

</mosaic_0001>

<bundles_post_ra>
// kernel: tpu_custom_call.1
= control target key start
LH: loop header
LB: loop body
LE: loop exit
PB: predicated region body
PF: predicated region fallthrough
CT: control target
= control target key end

     0   :  { %s2482_s0 = inlined_call_operand.vmem [shape: f32[256,32], index: 0, kind: input, shape index: {}]   ;;  %s2483_s1 = inlined_call_operand.vmem [shape: bf16[64,32], index: 1, kind: input, shape index: {}]   ;;  %s2484_s2 = inlined_call_operand.vmem [shape: f32[64,1], index: 2, kind: input, shape index: {}]   ;;  %s2485_s3 = inlined_call_operand.vmem [shape: bf16[128,64], index: 3, kind: input, shape index: {}]   ;;  %s2486_s4 = inlined_call_operand.vmem [shape: f32[128,1], index: 4, kind: input, shape index: {}]   ;;  %s2487_s5 = inlined_call_operand.vmem [shape: bf16[128,128], index: 5, kind: input, shape index: {}]   ;;  %s2488_s6 = inlined_call_operand.vmem [shape: f32[128,1], index: 6, kind: input, shape index: {}]   ;;  %s2489_s7 = inlined_call_operand.vmem [shape: bf16[64,128], index: 7, kind: input, shape index: {}]   ;;  %s2490_s8 = inlined_call_operand.vmem [shape: f32[64,1], index: 8, kind: input, shape index: {}]   ;;  %s2491_s9 = inlined_call_operand.vmem [shape: f32[64,1], index: 9, kind: input, shape index: {}]   ;;  %s2492_s10 = inlined_call_operand.<no memory space> [shape: f32[1,1], index: 10, kind: input, shape index: {}]   ;;  %s2493_s11 = inlined_call_operand.hbm [shape: f32[1,256], index: 11, kind: output, shape index: {}]  }
   0x1   :  { %v16_v0 = vstv %s2492_s10 }
   0x2   :  { %17 = vst [vmem:[#allocation2] sm:$0x1] %v16_v0 }
   0x3   :  { %18 = vsyncpa [#allocation4], 0 }
   0x4   :  { %20 = vsyncpa [#allocation4 + $0x1], 0  ;;  %s2097_s19 = smov 0   ;;  %s2099_s20 = smov 0  }
   0x5   :  { %s2101_s21 = smov 0   ;;  %s2103_s22 = smov 0  }
   0x6 LB: > { %s1594_s10 = sadd.s32 4294967295, %s2030_s22   ;;  %s1595_s23 = sadd.s32 4294967294, %s2030_s22   ;;  %s2030_s22 = sphi %s2103_s22, %s2499_s22   ;;  %s2026_s21 = sphi %s2101_s21, %s2498_s21   ;;  %s2022_s20 = sphi %s2099_s20, %s2497_s20   ;;  %s2018_s19 = sphi %s2097_s19, %s2496_s19  }
   0x7   : > { %s2120_s24 = sadd.s32 1, %s2030_s22   ;;  %s269_s25 = sadd.s32 1, %s2026_s21 }
   0x8   : > { %s266_s26 = ssub.s32 %s2030_s22, %s2120_s24  ;;  %p279_p0 = scmp.ne.s32.totalorder %s2026_s21, %s2022_s20 }
   0x9   : > { %p267_p1 = scmp.eq.s32.totalorder %s266_s26, 0  ;;  %p280_p2 = scmp.eq.s32.totalorder %s1594_s10, 1 }
   0xa   : > { %p285_p3 = scmp.ne.s32.totalorder %s2022_s20, %s2018_s19  ;;  %p286_p4 = scmp.eq.s32.totalorder %s1595_s23, 1 }
   0xb   : > { %s2130_s27 = scalar_select %p267_p1, %s2026_s21, %s269_s25  }
   0xc   : > { %p2132_p5 = por %p280_p2, %p279_p0  ;;  %p2136_p6 = por %p286_p4, %p285_p3 }
   0xd   : > { %p1598_p7 = scmp.ge.s32.totalorder %s2030_s22, 1  ;;  %p343_p8 = scmp.lt.s32.totalorder %s2030_s22, 3 }
   0xf   : > { %p344_p9 = pnand %p1598_p7, %p343_p8 }
  0x10   : > { %s2142_s30 = sshll.u32 (!%p344_p9), %s1594_s10, 4  ;;  %v421_v1 = vld [vmem:[%s2484_s2] sm:$0xff] (!%p344_p9)  ;;  %v423_v2 = vld [vmem:[%s2484_s2 + $0x10] sm:$0xff] (!%p344_p9)  ;;  %v2032_v3 = vmov (!%p344_p9), 0   ;;  %v422_v4 = vld [vmem:[%s2484_s2 + $0x8] sm:$0xff] (!%p344_p9)  ;;  %vm489_vm0 = vcmask (!%p344_p9), 261120  }
  0x11   : > { %347 = sbr.rel (%p344_p9) target bundleno = 1174 (0x496), region = 64  ;;  %p383_p10 = scmp.lt.s32.totalorder (!%p344_p9), %s2142_s30, 31  ;;  %1844 = vset.pattern.permute.xlu0 (!%p344_p9), %v2032_v3  ;;  %1845 = vset.pattern.permute.xlu1 (!%p344_p9), %v2032_v3  ;;  %v424_v5 = vld [vmem:[%s2484_s2 + $0x18] sm:$0xff] (!%p344_p9)  ;;  %v1846_v6 = vld [vmem:[%s2483_s1] sm:$0xff] (!%p344_p9)   ;;  %v426_v13 = vld [vmem:[%s2484_s2 + $0x28] sm:$0xff] (!%p344_p9)  ;;  %vm771_vm1 = vcmask (!%p344_p9), 523264  }
  0x12   : > { %431 = vperm.xlu0 (!%p344_p9), %1844, %v421_v1   ;;  %441 = vperm.xlu1 (!%p344_p9), %1845, %v423_v2   ;;  %v425_v7 = vld [vmem:[%s2484_s2 + $0x20] sm:$0xff] (!%p344_p9)  ;;  %v427_v16 = vld [vmem:[%s2484_s2 + $0x30] sm:$0xff] (!%p344_p9)  ;;  %v428_v17 = vld [vmem:[%s2484_s2 + $0x38] sm:$0xff] (!%p344_p9)  ;;  %s380_s18 = sand.u32 (!%p344_p9), 1, %s2022_s20   ;;  %s2033_s13 = smov (!%p344_p9), [#allocation3]  }
  0x13   : > { %1708 = vmatprep.mubr.msk.bf16.mxu0 (!%p344_p9), %vm489_vm0, %v1846_v6  ;;  %v635_v20 = vld [vmem:[%s2486_s4] sm:$0xff] (!%p344_p9)  ;;  %v636_v23 = vld [vmem:[%s2486_s4 + $0x8] sm:$0xff] (!%p344_p9)  ;;  %v637_v24 = vld [vmem:[%s2486_s4 + $0x10] sm:$0xff] (!%p344_p9)  ;;  %s1528_s26 = scalar_lea.sflag (!%p344_p9), [#allocation4], %s380_s18  ;;  %s1972_s14 = sshll.u32 (!%p344_p9), %s2033_s13, 4  ;;  %s1973_s14 = int_to_ptr.vmem [resolvable:$false] %s1972_s14 }
  0x14   : > { %v638_v27 = vld [vmem:[%s2486_s4 + $0x18] sm:$0xff] (!%p344_p9)  ;;  %v639_v31 = vld [vmem:[%s2486_s4 + $0x20] sm:$0xff] (!%p344_p9)  ;;  %v640_v34 = vld [vmem:[%s2486_s4 + $0x28] sm:$0xff] (!%p344_p9)  ;;  %s1974_s17 = scalar_lea.vmem (!%p344_p9), %s1973_s14, 32 }
  0x15   : > { %v641_v36 = vld [vmem:[%s2486_s4 + $0x30] sm:$0xff] (!%p344_p9)  ;;  %v642_v38 = vld [vmem:[%s2486_s4 + $0x38] sm:$0xff] (!%p344_p9)  ;;  %v643_v39 = vld [vmem:[%s2486_s4 + $0x40] sm:$0xff] (!%p344_p9) }
  0x16   : > { %436 = vperm.xlu0 (!%p344_p9), %1844, %v422_v4   ;;  %446 = vperm.xlu1 (!%p344_p9), %1845, %v424_v5   ;;  %v644_v40 = vld [vmem:[%s2486_s4 + $0x48] sm:$0xff] (!%p344_p9)  ;;  %v645_v41 = vld [vmem:[%s2486_s4 + $0x50] sm:$0xff] (!%p344_p9)  ;;  %v646_v42 = vld [vmem:[%s2486_s4 + $0x58] sm:$0xff] (!%p344_p9) }
  0x17   : > { %v647_v45 = vld [vmem:[%s2486_s4 + $0x60] sm:$0xff] (!%p344_p9)  ;;  %v648_v46 = vld [vmem:[%s2486_s4 + $0x68] sm:$0xff] (!%p344_p9)  ;;  %v649_v48 = vld [vmem:[%s2486_s4 + $0x70] sm:$0xff] (!%p344_p9) }
  0x18   : > { %s384_s16 = scalar_select %p383_p10, %s2142_s30, 31  ;;  %v650_v49 = vld [vmem:[%s2486_s4 + $0x78] sm:$0xff]  ;;  %v965_v52 = vld [vmem:[%s2488_s6] sm:$0xff]  ;;  %v966_v55 = vld [vmem:[%s2488_s6 + $0x8] sm:$0xff] }
  0x19   : > { %v967_v56 = vld [vmem:[%s2488_s6 + $0x10] sm:$0xff]  ;;  %v968_v57 = vld [vmem:[%s2488_s6 + $0x18] sm:$0xff]  ;;  %v969_v60 = vld [vmem:[%s2488_s6 + $0x20] sm:$0xff] }
  0x1a   : > { %s1600_s25 = sshll.u32 %s384_s16, 3  ;;  %451 = vperm.xlu0 %1844, %v425_v7   ;;  %456 = vperm.xlu1 %1845, %v426_v13   ;;  %v970_v63 = vld [vmem:[%s2488_s6 + $0x28] sm:$0xff]  ;;  %v971_v0 = vld [vmem:[%s2488_s6 + $0x30] sm:$0xff]  ;;  %v972_v1 = vld [vmem:[%s2488_s6 + $0x38] sm:$0xff]  ;;  %s381_s16 = scalar_lea.vmem [#allocation3], %s380_s18 }
  0x1b   : > { %s2164_s15 = scalar_lea.vmem %s2482_s0, %s1600_s25  ;;  %v973_v2 = vld [vmem:[%s2488_s6 + $0x40] sm:$0xff]  ;;  %v974_v4 = vld [vmem:[%s2488_s6 + $0x48] sm:$0xff]  ;;  %v975_v5 = vld [vmem:[%s2488_s6 + $0x50] sm:$0xff]  ;;  %s1540_s10 = sshll.u32 %s381_s16, 4  ;;  %s2442_s10 = int_to_ptr.vmem [resolvable:$true] %s1540_s10 }
  0x1c   : > { %v389_v8 = vld [vmem:[%s2164_s15] sm:$0xff]  ;;  %v390_v9 = vld [vmem:[%s2164_s15 + $0x8] sm:$0xff]  ;;  %v391_v10 = vld [vmem:[%s2164_s15 + $0x10] sm:$0xff]  ;;  %s2440_s25 = scalar_lea.hbm %s2493_s11, %s2142_s30  ;;  %s1968_s12 = scalar_lea.vmem %s2442_s10, 16 }
  0x1d   : > { %v405_v11 = vpack.c.bf16 %v390_v9, %v389_v8  ;;  %v392_v12 = vld [vmem:[%s2164_s15 + $0x18] sm:$0xff]  ;;  %v393_v18 = vld [vmem:[%s2164_s15 + $0x20] sm:$0xff]  ;;  %v394_v19 = vld [vmem:[%s2164_s15 + $0x28] sm:$0xff]  ;;  %p1969_p11 = scmp.ne.s32.totalorder %s2442_s10, %s1968_s12  ;;  %p1975_p0 = scmp.lt.s32.totalorder %s2442_s10, %s1973_s14 }
  0x1e   : > { %v406_v14 = vpack.c.bf16 %v392_v12, %v391_v10  ;;  %461 = vperm.xlu0 %1844, %v427_v16   ;;  %466 = vperm.xlu1 %1845, %v428_v17   ;;  %v407_v22 = vpack.c.bf16 %v394_v19, %v393_v18  ;;  %v395_v25 = vld [vmem:[%s2164_s15 + $0x30] sm:$0xff]  ;;  %v396_v26 = vld [vmem:[%s2164_s15 + $0x38] sm:$0xff]  ;;  %v397_v28 = vld [vmem:[%s2164_s15 + $0x40] sm:$0xff]  ;;  %p1976_p1 = scmp.lt.s32.totalorder %s1974_s17, %s1968_s12 }
  0x1f   : > { %1796 = vmatprep.subr.msk.bf16.mxu0 %vm489_vm0, %v405_v11  ;;  %v503_v15 = vsel %vm489_vm0, %v405_v11, 0  ;;  %v398_v29 = vld [vmem:[%s2164_s15 + $0x48] sm:$0xff]  ;;  %v408_v30 = vpack.c.bf16 %v396_v26, %v395_v25  ;;  %v399_v43 = vld [vmem:[%s2164_s15 + $0x50] sm:$0xff]  ;;  %v400_v44 = vld [vmem:[%s2164_s15 + $0x58] sm:$0xff]  ;;  %p1970_p12 = pnand %p1969_p11, %p2132_p5 }
  0x20   : > { %1693 = vmatpush3.bf16.xpose.msra.mxu0 %v503_v15  ;;  %v506_v21 = vsel %vm489_vm0, %v406_v14, 0  ;;  %v509_v32 = vsel %vm489_vm0, %v407_v22, 0  ;;  %v409_v33 = vpack.c.bf16 %v398_v29, %v397_v28  ;;  %v410_v47 = vpack.c.bf16 %v400_v44, %v399_v43  ;;  %v401_v50 = vld [vmem:[%s2164_s15 + $0x60] sm:$0xff]  ;;  %v402_v51 = vld [vmem:[%s2164_s15 + $0x68] sm:$0xff]  ;;  %v403_v58 = vld [vmem:[%s2164_s15 + $0x70] sm:$0xff]  ;;  %p1977_p2 = por %p1976_p1, %p1975_p0 }
  0x21   : > { %1797 = vmatprep.subr.msk.bf16.mxu0 %vm489_vm0, %v406_v14  ;;  %v512_v35 = vsel %vm489_vm0, %v408_v30, 0  ;;  %v411_v54 = vpack.c.bf16 %v402_v51, %v401_v50  ;;  %v404_v59 = vld [vmem:[%s2164_s15 + $0x78] sm:$0xff]  ;;  %v1847_v7 = vld [vmem:[%s2483_s1 + $0x8] sm:$0xff]   ;;  %v1848_v8 = vld [vmem:[%s2483_s1 + $0x10] sm:$0xff]   ;;  %p1971_p13 = pneg %p1970_p12 }
  0x22   : > { %653 = vperm.xlu0 %1844, %v635_v20   ;;  %658 = vperm.xlu1 %1845, %v636_v23   ;;  %v515_v37 = vsel %vm489_vm0, %v409_v33, 0  ;;  %v518_v53 = vsel %vm489_vm0, %v410_v47, 0  ;;  %v412_v62 = vpack.c.bf16 %v404_v59, %v403_v58  ;;  %v976_v6 = vld [vmem:[%s2488_s6 + $0x58] sm:$0xff]  ;;  %v977_v9 = vld [vmem:[%s2488_s6 + $0x60] sm:$0xff]  ;;  %v978_v10 = vld [vmem:[%s2488_s6 + $0x68] sm:$0xff] }
  0x23   : > { %v521_v61 = vsel %vm489_vm0, %v411_v54, 0  ;;  %v979_v11 = vld [vmem:[%s2488_s6 + $0x70] sm:$0xff]  ;;  %v980_v12 = vld [vmem:[%s2488_s6 + $0x78] sm:$0xff]  ;;  %v1270_v14 = vld [vmem:[%s2490_s8] sm:$0xff]  ;;  %p1978_p3 = pnand %p1977_p2, %p1971_p13 }
  0x24   : > { %v524_v3 = vsel %vm489_vm0, %v412_v62, 0  ;;  %v1849_v13 = vld [vmem:[%s2483_s1 + $0x18] sm:$0xff]   ;;  %v1271_v15 = vld [vmem:[%s2490_s8 + $0x8] sm:$0xff]  ;;  %v1272_v16 = vld [vmem:[%s2490_s8 + $0x10] sm:$0xff] }
  0x25   : > { %v1273_v17 = vld [vmem:[%s2490_s8 + $0x18] sm:$0xff]  ;;  %v1274_v18 = vld [vmem:[%s2490_s8 + $0x20] sm:$0xff]  ;;  %v1275_v19 = vld [vmem:[%s2490_s8 + $0x28] sm:$0xff] }
  0x26   : > { %663 = vperm.xlu0 %1844, %v637_v24   ;;  %668 = vperm.xlu1 %1845, %v638_v27   ;;  %v1276_v20 = vld [vmem:[%s2490_s8 + $0x30] sm:$0xff]  ;;  %v1444_v23 = vld [vmem:[%s2491_s9 + $0x8] sm:$0xff]  ;;  %v1446_v25 = vld [vmem:[%s2491_s9 + $0x18] sm:$0xff] }
  0x27   : > { %v1445_v24 = vld [vmem:[%s2491_s9 + $0x10] sm:$0xff]  ;;  %v1447_v26 = vld [vmem:[%s2491_s9 + $0x20] sm:$0xff]  ;;  %v1448_v27 = vld [vmem:[%s2491_s9 + $0x28] sm:$0xff] }
  0x28   : > { %1695 = vmatpush3.bf16.xpose.msra.mxu0 %v506_v21  ;;  %v1277_v21 = vld [vmem:[%s2490_s8 + $0x38] sm:$0xff]  ;;  %v1449_v28 = vld [vmem:[%s2491_s9 + $0x30] sm:$0xff] }
  0x29   : > { %1798 = vmatprep.subr.msk.bf16.mxu0 %vm489_vm0, %v407_v22  ;;  %v1443_v22 = vld [vmem:[%s2491_s9] sm:$0xff]  ;;  %v1450_v29 = vld [vmem:[%s2491_s9 + $0x38] sm:$0xff] }
  0x2a   : > { %673 = vperm.xlu0 %1844, %v639_v31   ;;  %678 = vperm.xlu1 %1845, %v640_v34   ;;  %v1850_v31 = vld [vmem:[%s2485_s3] sm:$0xff]  }
  0x2b   : > { %1724 = vmatprep.mubr.msk.bf16.mxu1 %vm771_vm1, %v1850_v31 }
  0x2e   : > { %683 = vperm.xlu0 %1844, %v641_v36   ;;  %688 = vperm.xlu1 %1845, %v642_v38  }
  0x30   : > { %1697 = vmatpush3.bf16.xpose.msra.mxu0 %v509_v32 }
  0x31   : > { %1799 = vmatprep.subr.msk.bf16.mxu0 %vm489_vm0, %v408_v30  ;;  %v1512_v30 = vld [vmem:[#allocation2] sm:$0x1] }
  0x32   : > { %693 = vperm.xlu0 %1844, %v643_v39   ;;  %698 = vperm.xlu1 %1845, %v644_v40  }
  0x36   : > { %703 = vperm.xlu0 %1844, %v645_v41   ;;  %708 = vperm.xlu1 %1845, %v646_v42  }
  0x38   : > { %1699 = vmatpush3.bf16.xpose.msra.mxu0 %v512_v35 }
  0x39   : > { %1800 = vmatprep.subr.msk.bf16.mxu0 %vm489_vm0, %v409_v33 }
  0x3a   : > { %713 = vperm.xlu0 %1844, %v647_v45   ;;  %718 = vperm.xlu1 %1845, %v648_v46  }
  0x3e   : > { %723 = vperm.xlu0 %1844, %v649_v48   ;;  %728 = vperm.xlu1 %1845, %v650_v49  }
  0x40   : > { %1701 = vmatpush3.bf16.xpose.msra.mxu0 %v515_v37 }
  0x41   : > { %1801 = vmatprep.subr.msk.bf16.mxu0 %vm489_vm0, %v410_v47 }
  0x42   : > { %983 = vperm.xlu0 %1844, %v965_v52   ;;  %988 = vperm.xlu1 %1845, %v966_v55  }
  0x46   : > { %993 = vperm.xlu0 %1844, %v967_v56   ;;  %998 = vperm.xlu1 %1845, %v968_v57  }
  0x48   : > { %1703 = vmatpush3.bf16.xpose.msra.mxu0 %v518_v53 }
  0x49   : > { %1802 = vmatprep.subr.msk.bf16.mxu0 %vm489_vm0, %v411_v54 }
  0x4a   : > { %1003 = vperm.xlu0 %1844, %v969_v60   ;;  %1008 = vperm.xlu1 %1845, %v970_v63  }
  0x4e   : > { %1013 = vperm.xlu0 %1844, %v971_v0   ;;  %1018 = vperm.xlu1 %1845, %v972_v1  }
  0x50   : > { %1705 = vmatpush3.bf16.xpose.msra.mxu0 %v521_v61 }
  0x51   : > { %1803 = vmatprep.subr.msk.bf16.mxu0 %vm489_vm0, %v412_v62 }
  0x52   : > { %1023 = vperm.xlu0 %1844, %v973_v2   ;;  %1028 = vperm.xlu1 %1845, %v974_v4  }
  0x56   : > { %1033 = vperm.xlu0 %1844, %v975_v5   ;;  %1038 = vperm.xlu1 %1845, %v976_v6  }
  0x58   : > { %1707 = vmatpush3.bf16.xpose.msra.mxu0 %v524_v3 }
  0x5a   : > { %1043 = vperm.xlu0 %1844, %v977_v9   ;;  %1048 = vperm.xlu1 %1845, %v978_v10  }
  0x5e   : > { %1053 = vperm.xlu0 %1844, %v979_v11   ;;  %1058 = vperm.xlu1 %1845, %v980_v12  }
  0x5f   : > { %1709 = vmatmul.mubr.msk.bf16.vlgmr.msra.gmra.mrb[0].mxu0 %vm489_vm0, %v1847_v7 }
  0x60   : > { %1712 = vmatprep.mubr.msk.bf16.mxu0 %vm489_vm0, %v1848_v8 }
  0x62   : > { %1280 = vperm.xlu0 %1844, %v1270_v14   ;;  %1285 = vperm.xlu1 %1845, %v1271_v15  }
  0x66   : > { %1290 = vperm.xlu0 %1844, %v1272_v16   ;;  %1295 = vperm.xlu1 %1845, %v1273_v17  }
  0x67   : > { %1713 = vmatmul.mubr.msk.bf16.gmra.mrb[4].mxu0 %vm489_vm0, %v1849_v13 }
  0x6a   : > { %1300 = vperm.xlu0 %1844, %v1274_v18   ;;  %1305 = vperm.xlu1 %1845, %v1275_v19  }
  0x6e   : > { %1310 = vperm.xlu0 %1844, %v1276_v20   ;;  %1315 = vperm.xlu1 %1845, %v1277_v21   ;;  %v1851_v20 = vld [vmem:[%s2485_s3 + $0x8] sm:$0xff]   ;;  %v1852_v21 = vld [vmem:[%s2485_s3 + $0x10] sm:$0xff]  }
  0x72   : > { %1453 = vperm.xlu0 %1844, %v1443_v22   ;;  %1458 = vperm.xlu1 %1845, %v1444_v23   ;;  %v1853_v22 = vld [vmem:[%s2485_s3 + $0x18] sm:$0xff]   ;;  %v1854_v23 = vld [vmem:[%s2485_s3 + $0x20] sm:$0xff]  }
  0x76   : > { %1463 = vperm.xlu0 %1844, %v1445_v24   ;;  %1468 = vperm.xlu1 %1845, %v1446_v25   ;;  %v1855_v24 = vld [vmem:[%s2485_s3 + $0x28] sm:$0xff]   ;;  %v1856_v25 = vld [vmem:[%s2485_s3 + $0x30] sm:$0xff]  }
  0x7a   : > { %1473 = vperm.xlu0 %1844, %v1447_v26   ;;  %1478 = vperm.xlu1 %1845, %v1448_v27   ;;  %v1857_v26 = vld [vmem:[%s2485_s3 + $0x38] sm:$0xff]   ;;  %v1858_v27 = vld [vmem:[%s2487_s5] sm:$0xff]  }
  0x7e   : > { %1483 = vperm.xlu0 %1844, %v1449_v28   ;;  %1488 = vperm.xlu1 %1845, %v1450_v29  }
  0x82   : > { %1515 = vperm.xlu0 %1844, %v1512_v30  }
  0x91   : > { %v432_v32 = vpop.permute.xlu0 %431  ;;  %v442_v33 = vpop.permute.xlu1 %441 }
  0x95   : > { %v437_v34 = vpop.permute.xlu0 %436  ;;  %v447_v35 = vpop.permute.xlu1 %446 }
  0x99   : > { %v452_v39 = vpop.permute.xlu0 %451  ;;  %v457_v44 = vpop.permute.xlu1 %456 }
  0x9d   : > { %v462_v46 = vpop.permute.xlu0 %461  ;;  %v467_v50 = vpop.permute.xlu1 %466 }
  0xa1   : > { %v654_v28 = vpop.permute.xlu0 %653  ;;  %v659_v29 = vpop.permute.xlu1 %658 }
  0xa5   : > { %v664_v30 = vpop.permute.xlu0 %663  ;;  %v669_v31 = vpop.permute.xlu1 %668 }
 0x132   : > { %v1710_v36 = vpop.f32.mrb[0].mxu0 }
 0x133   : > { %v569_v37 = vadd.f32 %v1710_v36, %v442_v33  ;;  %v560_v38 = vpop.f32.mrb[1].mxu0  ;;  %v679_v33 = vpop.permute.xlu1 %678 }
 0x134   : > { %v561_v40 = vadd.f32 %v560_v38, %v432_v32  ;;  %v1711_v41 = vpop.f32.mrb[2].mxu0  ;;  %v674_v32 = vpop.permute.xlu0 %673 }
 0x135   : > { %1870 = vtanh.f32 %v569_v37  ;;  %v572_v42 = vadd.f32 %v1711_v41, %v447_v35  ;;  %v563_v43 = vpop.f32.mrb[3].mxu0 }
 0x136   : > { %1872 = vtanh.f32 %v561_v40  ;;  %v564_v45 = vadd.f32 %v563_v43, %v437_v34 }
 0x137   : > { %1874 = vtanh.f32 %v572_v42  ;;  %v689_v38 = vpop.permute.xlu1 %688 }
 0x138   : > { %1876 = vtanh.f32 %v564_v45  ;;  %v684_v34 = vpop.permute.xlu0 %683 }
 0x13a   : > { %v1714_v47 = vpop.f32.mrb[4].mxu0 }
 0x13b   : > { %v585_v48 = vadd.f32 %v1714_v47, %v462_v46  ;;  %v576_v49 = vpop.f32.mrb[5].mxu0  ;;  %v699_v45 = vpop.permute.xlu1 %698 }
 0x13c   : > { %v577_v51 = vadd.f32 %v576_v49, %v452_v39  ;;  %v1715_v52 = vpop.f32.mrb[6].mxu0 }
 0x13d   : > { %1878 = vtanh.f32 %v585_v48  ;;  %v588_v53 = vadd.f32 %v1715_v52, %v467_v50  ;;  %v579_v54 = vpop.f32.mrb[7].mxu0 }
 0x13e   : > { %1880 = vtanh.f32 %v577_v51  ;;  %v580_v55 = vadd.f32 %v579_v54, %v457_v44  ;;  %v694_v44 = vpop.permute.xlu0 %693 }
 0x13f   : > { %v1871_v56 = vpop.eup %1870  ;;  %1882 = vtanh.f32 %v588_v53 }
 0x140   : > { %v1873_v57 = vpop.eup %1872  ;;  %v601_v58 = vmul.f32 0.5, %v1871_v56  ;;  %1884 = vtanh.f32 %v580_v55 }
 0x141   : > { %v1875_v59 = vpop.eup %1874  ;;  %v599_v60 = vmul.f32 0.5, %v1873_v57  ;;  %v709_v57 = vpop.permute.xlu1 %708 }
 0x142   : > { %v1877_v61 = vpop.eup %1876  ;;  %v602_v62 = vmul.f32 0.5, %v1875_v59  ;;  %v609_v0 = vadd.f32 0.5, %v601_v58  ;;  %v704_v53 = vpop.permute.xlu0 %703 }
 0x143   : > { %v600_v63 = vmul.f32 0.5, %v1877_v61  ;;  %v607_v2 = vadd.f32 0.5, %v599_v60 }
 0x144   : > { %v610_v1 = vadd.f32 0.5, %v602_v62 }
 0x145   : > { %v608_v3 = vadd.f32 0.5, %v600_v63 }
 0x146   : > { %v616_v4 = vpack.c.bf16 %v610_v1, %v609_v0 }
 0x147   : > { %v1879_v5 = vpop.eup %1878  ;;  %v615_v6 = vpack.c.bf16 %v608_v3, %v607_v2  ;;  %v714_v3 = vpop.permute.xlu0 %713 }
 0x148   : > { %v1881_v7 = vpop.eup %1880  ;;  %v605_v8 = vmul.f32 0.5, %v1879_v5 }
 0x149   : > { %v1883_v9 = vpop.eup %1882  ;;  %v603_v10 = vmul.f32 0.5, %v1881_v7  ;;  %1716 = vmatprep.subr.bf16.mxu1 %v615_v6 }
 0x14a   : > { %v1885_v11 = vpop.eup %1884  ;;  %v606_v12 = vmul.f32 0.5, %v1883_v9  ;;  %1717 = vmatpush3.bf16.msra.mxu1 %v615_v6  ;;  %v613_v14 = vadd.f32 0.5, %v605_v8 }
 0x14b   : > { %v604_v13 = vmul.f32 0.5, %v1885_v11  ;;  %1718 = vmatprep.subr.bf16.mxu1 %v616_v4  ;;  %v611_v16 = vadd.f32 0.5, %v603_v10 }
 0x14c   : > { %v614_v15 = vadd.f32 0.5, %v606_v12  ;;  %v719_v12 = vpop.permute.xlu1 %718 }
 0x14d   : > { %v612_v17 = vadd.f32 0.5, %v604_v13 }
 0x14e   : > { %1719 = vmatpush3.bf16.msra.mxu1 %v616_v4  ;;  %v618_v18 = vpack.c.bf16 %v614_v15, %v613_v14 }
 0x14f   : > { %v617_v19 = vpack.c.bf16 %v612_v17, %v611_v16 }
 0x151   : > { %1720 = vmatprep.subr.bf16.mxu1 %v617_v19 }
 0x152   : > { %1721 = vmatpush3.bf16.msra.mxu1 %v617_v19 }
 0x153   : > { %1722 = vmatprep.subr.bf16.mxu1 %v618_v18 }
 0x156   : > { %1723 = vmatpush3.bf16.msra.mxu1 %v618_v18 }
 0x159   : > { %1725 = vmatmul.mubr.msk.bf16.vlgmr.msra.gmra.mrb[0].mxu1 %vm771_vm1, %v1851_v20 }
 0x15a   : > { %1728 = vmatprep.mubr.msk.bf16.mxu1 %vm771_vm1, %v1852_v21 }
 0x161   : > { %1729 = vmatmul.mubr.msk.bf16.gmra.mrb[4].mxu1 %vm771_vm1, %v1853_v22  ;;  %v724_v22 = vpop.permute.xlu0 %723 }
 0x162   : > { %1732 = vmatprep.mubr.msk.bf16.mxu1 %vm771_vm1, %v1854_v23 }
 0x169   : > { %1733 = vmatmul.mubr.msk.bf16.gmra.mrb[8].mxu1 %vm771_vm1, %v1855_v24 }
 0x16a   : > { %1736 = vmatprep.mubr.msk.bf16.mxu1 %vm771_vm1, %v1856_v25 }
 0x171   : > { %1737 = vmatmul.mubr.msk.bf16.gmra.mrb[12].mxu1 %vm771_vm1, %v1857_v26 }
 0x172   : > { %1756 = vmatprep.mubr.bf16.mxu1 %v1858_v27 }
 0x22c   : > { %v1726_v35 = vpop.f32.mrb[0].mxu1 }
 0x22d   : > { %v839_v36 = vadd.f32 %v1726_v35, %v664_v30  ;;  %v830_v37 = vpop.f32.mrb[1].mxu1 }
 0x22e   : > { %v831_v39 = vadd.f32 %v830_v37, %v654_v28  ;;  %v1727_v40 = vpop.f32.mrb[2].mxu1  ;;  %v729_v28 = vpop.permute.xlu1 %728 }
 0x22f   : > { %1886 = vtanh.f32 %v839_v36  ;;  %v842_v41 = vadd.f32 %v1727_v40, %v669_v31  ;;  %v833_v42 = vpop.f32.mrb[3].mxu1 }
 0x230   : > { %1888 = vtanh.f32 %v831_v39  ;;  %v834_v43 = vadd.f32 %v833_v42, %v659_v29 }
 0x231   : > { %1890 = vtanh.f32 %v842_v41 }
 0x232   : > { %1892 = vtanh.f32 %v834_v43 }
 0x234   : > { %v1730_v46 = vpop.f32.mrb[4].mxu1 }
 0x235   : > { %v855_v47 = vadd.f32 %v1730_v46, %v684_v34  ;;  %v846_v48 = vpop.f32.mrb[5].mxu1 }
 0x236   : > { %v847_v49 = vadd.f32 %v846_v48, %v674_v32  ;;  %v1731_v50 = vpop.f32.mrb[6].mxu1 }
 0x237   : > { %1894 = vtanh.f32 %v855_v47  ;;  %v858_v51 = vadd.f32 %v1731_v50, %v689_v38  ;;  %v849_v52 = vpop.f32.mrb[7].mxu1 }
 0x238   : > { %1896 = vtanh.f32 %v847_v49  ;;  %v850_v54 = vadd.f32 %v849_v52, %v679_v33 }
 0x239   : > { %v1887_v55 = vpop.eup %1886  ;;  %1898 = vtanh.f32 %v858_v51 }
 0x23a   : > { %v1889_v56 = vpop.eup %1888  ;;  %v911_v58 = vmul.f32 0.5, %v1887_v55  ;;  %1900 = vtanh.f32 %v850_v54 }
 0x23b   : > { %v1891_v59 = vpop.eup %1890  ;;  %v909_v60 = vmul.f32 0.5, %v1889_v56 }
 0x23c   : > { %v1893_v61 = vpop.eup %1892  ;;  %v912_v62 = vmul.f32 0.5, %v1891_v59  ;;  %v1734_v63 = vpop.f32.mrb[8].mxu1  ;;  %v927_v4 = vadd.f32 0.5, %v911_v58 }
 0x23d   : > { %v910_v0 = vmul.f32 0.5, %v1893_v61  ;;  %v871_v1 = vadd.f32 %v1734_v63, %v704_v53  ;;  %v862_v2 = vpop.f32.mrb[9].mxu1  ;;  %v925_v8 = vadd.f32 0.5, %v909_v60 }
 0x23e   : > { %v928_v5 = vadd.f32 0.5, %v912_v62  ;;  %v863_v6 = vadd.f32 %v862_v2, %v694_v44  ;;  %v1735_v7 = vpop.f32.mrb[10].mxu1 }
 0x23f   : > { %v926_v9 = vadd.f32 0.5, %v910_v0  ;;  %1902 = vtanh.f32 %v871_v1  ;;  %v874_v10 = vadd.f32 %v1735_v7, %v709_v57  ;;  %v865_v11 = vpop.f32.mrb[11].mxu1  ;;  %v1862_v7 = vld [vmem:[%s2487_s5 + $0x20] sm:$0xff]  }
 0x240   : > { %1904 = vtanh.f32 %v863_v6  ;;  %v866_v13 = vadd.f32 %v865_v11, %v699_v45  ;;  %v942_v14 = vpack.c.bf16 %v928_v5, %v927_v4  ;;  %v1859_v4 = vld [vmem:[%s2487_s5 + $0x8] sm:$0xff]   ;;  %v1860_v5 = vld [vmem:[%s2487_s5 + $0x10] sm:$0xff]   ;;  %v1861_v6 = vld [vmem:[%s2487_s5 + $0x18] sm:$0xff]  }
 0x241   : > { %v1895_v15 = vpop.eup %1894  ;;  %1906 = vtanh.f32 %v874_v10  ;;  %v941_v16 = vpack.c.bf16 %v926_v9, %v925_v8  ;;  %v1863_v8 = vld [vmem:[%s2487_s5 + $0x28] sm:$0xff]   ;;  %v1864_v9 = vld [vmem:[%s2487_s5 + $0x30] sm:$0xff]   ;;  %v1865_v10 = vld [vmem:[%s2487_s5 + $0x38] sm:$0xff]  }
 0x242   : > { %v1897_v17 = vpop.eup %1896  ;;  %v915_v18 = vmul.f32 0.5, %v1895_v15  ;;  %1908 = vtanh.f32 %v866_v13  ;;  %v1866_v11 = vld [vmem:[%s2489_s7] sm:$0xff]   ;;  %v989_v13 = vpop.permute.xlu1 %988 }
 0x243   : > { %v1899_v19 = vpop.eup %1898  ;;  %v913_v20 = vmul.f32 0.5, %v1897_v17  ;;  %1740 = vmatprep.subr.bf16.mxu1 %v941_v16 }
 0x244   : > { %v1901_v21 = vpop.eup %1900  ;;  %v916_v23 = vmul.f32 0.5, %v1899_v19  ;;  %v1738_v24 = vpop.f32.mrb[12].mxu1  ;;  %1741 = vmatpush3.bf16.msra.mxu1 %v941_v16  ;;  %v931_v29 = vadd.f32 0.5, %v915_v18 }
 0x245   : > { %v914_v25 = vmul.f32 0.5, %v1901_v21  ;;  %v887_v26 = vadd.f32 %v1738_v24, %v724_v22  ;;  %v878_v27 = vpop.f32.mrb[13].mxu1  ;;  %1742 = vmatprep.subr.bf16.mxu1 %v942_v14  ;;  %v929_v33 = vadd.f32 0.5, %v913_v20 }
 0x246   : > { %v932_v30 = vadd.f32 0.5, %v916_v23  ;;  %v879_v31 = vadd.f32 %v878_v27, %v714_v3  ;;  %v1739_v32 = vpop.f32.mrb[14].mxu1  ;;  %v999_v15 = vpop.permute.xlu1 %998 }
 0x247   : > { %v930_v34 = vadd.f32 0.5, %v914_v25  ;;  %1910 = vtanh.f32 %v887_v26  ;;  %v890_v35 = vadd.f32 %v1739_v32, %v729_v28  ;;  %v881_v36 = vpop.f32.mrb[15].mxu1 }
 0x248   : > { %1912 = vtanh.f32 %v879_v31  ;;  %v882_v37 = vadd.f32 %v881_v36, %v719_v12  ;;  %1743 = vmatpush3.bf16.msra.mxu1 %v942_v14  ;;  %v944_v38 = vpack.c.bf16 %v932_v30, %v931_v29  ;;  %v984_v12 = vpop.permute.xlu0 %983 }
 0x249   : > { %v1903_v39 = vpop.eup %1902  ;;  %1914 = vtanh.f32 %v890_v35  ;;  %v943_v40 = vpack.c.bf16 %v930_v34, %v929_v33 }
 0x24a   : > { %v1905_v41 = vpop.eup %1904  ;;  %v919_v42 = vmul.f32 0.5, %v1903_v39  ;;  %1916 = vtanh.f32 %v882_v37  ;;  %v1009_v17 = vpop.permute.xlu1 %1008 }
 0x24b   : > { %v1907_v43 = vpop.eup %1906  ;;  %v917_v44 = vmul.f32 0.5, %v1905_v41  ;;  %1744 = vmatprep.subr.bf16.mxu1 %v943_v40 }
 0x24c   : > { %v1909_v45 = vpop.eup %1908  ;;  %v920_v46 = vmul.f32 0.5, %v1907_v43  ;;  %1745 = vmatpush3.bf16.msra.mxu1 %v943_v40  ;;  %v935_v48 = vadd.f32 0.5, %v919_v42  ;;  %v994_v14 = vpop.permute.xlu0 %993 }
 0x24d   : > { %v918_v47 = vmul.f32 0.5, %v1909_v45  ;;  %1746 = vmatprep.subr.bf16.mxu1 %v944_v38  ;;  %v933_v50 = vadd.f32 0.5, %v917_v44 }
 0x24e   : > { %v936_v49 = vadd.f32 0.5, %v920_v46  ;;  %v1019_v22 = vpop.permute.xlu1 %1018 }
 0x24f   : > { %v934_v51 = vadd.f32 0.5, %v918_v47 }
 0x250   : > { %1747 = vmatpush3.bf16.msra.mxu1 %v944_v38  ;;  %v946_v52 = vpack.c.bf16 %v936_v49, %v935_v48  ;;  %v1004_v16 = vpop.permute.xlu0 %1003 }
 0x251   : > { %v1911_v53 = vpop.eup %1910  ;;  %v945_v54 = vpack.c.bf16 %v934_v51, %v933_v50 }
 0x252   : > { %v1913_v55 = vpop.eup %1912  ;;  %v923_v56 = vmul.f32 0.5, %v1911_v53  ;;  %v1029_v29 = vpop.permute.xlu1 %1028 }
 0x253   : > { %v1915_v57 = vpop.eup %1914  ;;  %v921_v58 = vmul.f32 0.5, %v1913_v55  ;;  %1748 = vmatprep.subr.bf16.mxu1 %v945_v54 }
 0x254   : > { %v1917_v59 = vpop.eup %1916  ;;  %v924_v60 = vmul.f32 0.5, %v1915_v57  ;;  %1749 = vmatpush3.bf16.msra.mxu1 %v945_v54  ;;  %v939_v62 = vadd.f32 0.5, %v923_v56  ;;  %v1014_v18 = vpop.permute.xlu0 %1013 }
 0x255   : > { %v922_v61 = vmul.f32 0.5, %v1917_v59  ;;  %1750 = vmatprep.subr.bf16.mxu1 %v946_v52  ;;  %v937_v0 = vadd.f32 0.5, %v921_v58 }
 0x256   : > { %v940_v63 = vadd.f32 0.5, %v924_v60  ;;  %v1039_v41 = vpop.permute.xlu1 %1038 }
 0x257   : > { %v938_v1 = vadd.f32 0.5, %v922_v61 }
 0x258   : > { %1751 = vmatpush3.bf16.msra.mxu1 %v946_v52  ;;  %v948_v2 = vpack.c.bf16 %v940_v63, %v939_v62  ;;  %v1024_v28 = vpop.permute.xlu0 %1023 }
 0x259   : > { %v947_v3 = vpack.c.bf16 %v938_v1, %v937_v0 }
 0x25a   : > { %v1049_v60 = vpop.permute.xlu1 %1048 }
 0x25b   : > { %1752 = vmatprep.subr.bf16.mxu1 %v947_v3 }
 0x25c   : > { %1753 = vmatpush3.bf16.msra.mxu1 %v947_v3  ;;  %v1034_v37 = vpop.permute.xlu0 %1033 }
 0x25d   : > { %1754 = vmatprep.subr.bf16.mxu1 %v948_v2 }
 0x260   : > { %1755 = vmatpush3.bf16.msra.mxu1 %v948_v2  ;;  %v1044_v51 = vpop.permute.xlu0 %1043 }
 0x263   : > { %1757 = vmatmul.mubr.bf16.vlgmr.msra.gmra.mrb[16].mxu1 %v1859_v4 }
 0x264   : > { %1760 = vmatprep.mubr.bf16.mxu1 %v1860_v5 }
 0x26b   : > { %1761 = vmatmul.mubr.bf16.gmra.mrb[20].mxu1 %v1861_v6  ;;  %v1054_v6 = vpop.permute.xlu0 %1053 }
 0x26c   : > { %1764 = vmatprep.mubr.bf16.mxu1 %v1862_v7 }
 0x273   : > { %1765 = vmatmul.mubr.bf16.gmra.mrb[24].mxu1 %v1863_v8 }
 0x274   : > { %1768 = vmatprep.mubr.bf16.mxu1 %v1864_v9 }
 0x27b   : > { %1769 = vmatmul.mubr.bf16.gmra.mrb[28].mxu1 %v1865_v10 }
 0x27c   : > { %1788 = vmatprep.mubr.bf16.mxu1 %v1866_v11 }
 0x336   : > { %v1758_v19 = vpop.f32.mrb[16].mxu1 }
 0x337   : > { %v1152_v20 = vadd.f32 %v1758_v19, %v994_v14  ;;  %v1143_v21 = vpop.f32.mrb[17].mxu1 }
 0x338   : > { %v1144_v23 = vadd.f32 %v1143_v21, %v984_v12  ;;  %v1759_v24 = vpop.f32.mrb[18].mxu1  ;;  %v1059_v12 = vpop.permute.xlu1 %1058 }
 0x339   : > { %1918 = vtanh.f32 %v1152_v20  ;;  %v1155_v25 = vadd.f32 %v1759_v24, %v999_v15  ;;  %v1146_v26 = vpop.f32.mrb[19].mxu1 }
 0x33a   : > { %1920 = vtanh.f32 %v1144_v23  ;;  %v1147_v27 = vadd.f32 %v1146_v26, %v989_v13 }
 0x33b   : > { %1922 = vtanh.f32 %v1155_v25 }
 0x33c   : > { %1924 = vtanh.f32 %v1147_v27 }
 0x33e   : > { %v1762_v30 = vpop.f32.mrb[20].mxu1 }
 0x33f   : > { %v1168_v31 = vadd.f32 %v1762_v30, %v1014_v18  ;;  %v1159_v32 = vpop.f32.mrb[21].mxu1 }
 0x340   : > { %v1160_v33 = vadd.f32 %v1159_v32, %v1004_v16  ;;  %v1763_v34 = vpop.f32.mrb[22].mxu1 }
 0x341   : > { %1926 = vtanh.f32 %v1168_v31  ;;  %v1171_v35 = vadd.f32 %v1763_v34, %v1019_v22  ;;  %v1162_v36 = vpop.f32.mrb[23].mxu1 }
 0x342   : > { %1928 = vtanh.f32 %v1160_v33  ;;  %v1163_v38 = vadd.f32 %v1162_v36, %v1009_v17 }
 0x343   : > { %v1919_v39 = vpop.eup %1918  ;;  %1930 = vtanh.f32 %v1171_v35 }
 0x344   : > { %v1921_v40 = vpop.eup %1920  ;;  %v1224_v42 = vmul.f32 0.5, %v1919_v39  ;;  %1932 = vtanh.f32 %v1163_v38 }
 0x345   : > { %v1923_v43 = vpop.eup %1922  ;;  %v1222_v44 = vmul.f32 0.5, %v1921_v40 }
 0x346   : > { %v1925_v45 = vpop.eup %1924  ;;  %v1225_v46 = vmul.f32 0.5, %v1923_v43  ;;  %v1766_v47 = vpop.f32.mrb[24].mxu1  ;;  %v1240_v52 = vadd.f32 0.5, %v1224_v42 }
 0x347   : > { %v1223_v48 = vmul.f32 0.5, %v1925_v45  ;;  %v1184_v49 = vadd.f32 %v1766_v47, %v1034_v37  ;;  %v1175_v50 = vpop.f32.mrb[25].mxu1  ;;  %v1238_v56 = vadd.f32 0.5, %v1222_v44 }
 0x348   : > { %v1241_v53 = vadd.f32 0.5, %v1225_v46  ;;  %v1176_v54 = vadd.f32 %v1175_v50, %v1024_v28  ;;  %v1767_v55 = vpop.f32.mrb[26].mxu1 }
 0x349   : > { %v1239_v57 = vadd.f32 0.5, %v1223_v48  ;;  %1934 = vtanh.f32 %v1184_v49  ;;  %v1187_v58 = vadd.f32 %v1767_v55, %v1039_v41  ;;  %v1178_v59 = vpop.f32.mrb[27].mxu1  ;;  %v1281_v55 = vpop.permute.xlu0 %1280 }
 0x34a   : > { %1936 = vtanh.f32 %v1176_v54  ;;  %v1179_v61 = vadd.f32 %v1178_v59, %v1029_v29  ;;  %v1255_v62 = vpack.c.bf16 %v1241_v53, %v1240_v52  ;;  %v1867_v52 = vld [vmem:[%s2489_s7 + $0x8] sm:$0xff]   ;;  %v1868_v53 = vld [vmem:[%s2489_s7 + $0x10] sm:$0xff]   ;;  %v1869_v54 = vld [vmem:[%s2489_s7 + $0x18] sm:$0xff]  }
 0x34b   : > { %v1927_v63 = vpop.eup %1926  ;;  %1938 = vtanh.f32 %v1187_v58  ;;  %v1254_v0 = vpack.c.bf16 %v1239_v57, %v1238_v56  ;;  %v1286_v56 = vpop.permute.xlu1 %1285 }
 0x34c   : > { %v1929_v1 = vpop.eup %1928  ;;  %v1228_v2 = vmul.f32 0.5, %v1927_v63  ;;  %1940 = vtanh.f32 %v1179_v61 }
 0x34d   : > { %v1931_v3 = vpop.eup %1930  ;;  %v1226_v4 = vmul.f32 0.5, %v1929_v1  ;;  %1772 = vmatprep.subr.bf16.mxu1 %v1254_v0  ;;  %v1291_v57 = vpop.permute.xlu0 %1290 }
 0x34e   : > { %v1933_v5 = vpop.eup %1932  ;;  %v1229_v7 = vmul.f32 0.5, %v1931_v3  ;;  %v1770_v8 = vpop.f32.mrb[28].mxu1  ;;  %1773 = vmatpush3.bf16.msra.mxu1 %v1254_v0  ;;  %v1244_v13 = vadd.f32 0.5, %v1228_v2 }
 0x34f   : > { %v1227_v9 = vmul.f32 0.5, %v1933_v5  ;;  %v1200_v10 = vadd.f32 %v1770_v8, %v1054_v6  ;;  %v1191_v11 = vpop.f32.mrb[29].mxu1  ;;  %1774 = vmatprep.subr.bf16.mxu1 %v1255_v62  ;;  %v1242_v17 = vadd.f32 0.5, %v1226_v4  ;;  %v1296_v58 = vpop.permute.xlu1 %1295 }
 0x350   : > { %v1245_v14 = vadd.f32 0.5, %v1229_v7  ;;  %v1192_v15 = vadd.f32 %v1191_v11, %v1044_v51  ;;  %v1771_v16 = vpop.f32.mrb[30].mxu1 }
 0x351   : > { %v1243_v18 = vadd.f32 0.5, %v1227_v9  ;;  %1942 = vtanh.f32 %v1200_v10  ;;  %v1203_v19 = vadd.f32 %v1771_v16, %v1059_v12  ;;  %v1194_v20 = vpop.f32.mrb[31].mxu1 }
 0x352   : > { %1944 = vtanh.f32 %v1192_v15  ;;  %v1195_v21 = vadd.f32 %v1194_v20, %v1049_v60  ;;  %1775 = vmatpush3.bf16.msra.mxu1 %v1255_v62  ;;  %v1257_v22 = vpack.c.bf16 %v1245_v14, %v1244_v13  ;;  %v1301_v62 = vpop.permute.xlu0 %1300 }
 0x353   : > { %v1935_v23 = vpop.eup %1934  ;;  %1946 = vtanh.f32 %v1203_v19  ;;  %v1256_v24 = vpack.c.bf16 %v1243_v18, %v1242_v17  ;;  %v1306_v3 = vpop.permute.xlu1 %1305 }
 0x354   : > { %v1937_v25 = vpop.eup %1936  ;;  %v1232_v26 = vmul.f32 0.5, %v1935_v23  ;;  %1948 = vtanh.f32 %v1195_v21 }
 0x355   : > { %v1939_v27 = vpop.eup %1938  ;;  %v1230_v28 = vmul.f32 0.5, %v1937_v25  ;;  %1776 = vmatprep.subr.bf16.mxu1 %v1256_v24 }
 0x356   : > { %v1941_v29 = vpop.eup %1940  ;;  %v1233_v30 = vmul.f32 0.5, %v1939_v27  ;;  %1777 = vmatpush3.bf16.msra.mxu1 %v1256_v24  ;;  %v1248_v32 = vadd.f32 0.5, %v1232_v26  ;;  %v1311_v5 = vpop.permute.xlu0 %1310 }
 0x357   : > { %v1231_v31 = vmul.f32 0.5, %v1941_v29  ;;  %1778 = vmatprep.subr.bf16.mxu1 %v1257_v22  ;;  %v1246_v34 = vadd.f32 0.5, %v1230_v28  ;;  %v1316_v9 = vpop.permute.xlu1 %1315 }
 0x358   : > { %v1249_v33 = vadd.f32 0.5, %v1233_v30 }
 0x359   : > { %v1247_v35 = vadd.f32 0.5, %v1231_v31 }
 0x35a   : > { %1779 = vmatpush3.bf16.msra.mxu1 %v1257_v22  ;;  %v1259_v36 = vpack.c.bf16 %v1249_v33, %v1248_v32  ;;  %v1454_v23 = vpop.permute.xlu0 %1453 }
 0x35b   : > { %v1943_v37 = vpop.eup %1942  ;;  %v1258_v38 = vpack.c.bf16 %v1247_v35, %v1246_v34  ;;  %v1459_v28 = vpop.permute.xlu1 %1458 }
 0x35c   : > { %v1945_v39 = vpop.eup %1944  ;;  %v1236_v40 = vmul.f32 0.5, %v1943_v37 }
 0x35d   : > { %v1947_v41 = vpop.eup %1946  ;;  %v1234_v42 = vmul.f32 0.5, %v1945_v39  ;;  %1780 = vmatprep.subr.bf16.mxu1 %v1258_v38 }
 0x35e   : > { %v1949_v43 = vpop.eup %1948  ;;  %v1237_v44 = vmul.f32 0.5, %v1947_v41  ;;  %1781 = vmatpush3.bf16.msra.mxu1 %v1258_v38  ;;  %v1252_v46 = vadd.f32 0.5, %v1236_v40  ;;  %v1464_v40 = vpop.permute.xlu0 %1463 }
 0x35f   : > { %v1235_v45 = vmul.f32 0.5, %v1949_v43  ;;  %1782 = vmatprep.subr.bf16.mxu1 %v1259_v36  ;;  %v1250_v48 = vadd.f32 0.5, %v1234_v42 }
 0x360   : > { %v1253_v47 = vadd.f32 0.5, %v1237_v44 }
 0x361   : > { %v1251_v49 = vadd.f32 0.5, %v1235_v45 }
 0x362   : > { %1783 = vmatpush3.bf16.msra.mxu1 %v1259_v36  ;;  %v1261_v50 = vpack.c.bf16 %v1253_v47, %v1252_v46  ;;  %v1469_v46 = vpop.permute.xlu1 %1468 }
 0x363   : > { %v1260_v51 = vpack.c.bf16 %v1251_v49, %v1250_v48 }
 0x365   : > { %1784 = vmatprep.subr.bf16.mxu1 %v1260_v51 }
 0x366   : > { %1785 = vmatpush3.bf16.msra.mxu1 %v1260_v51 }
 0x367   : > { %1786 = vmatprep.subr.bf16.mxu1 %v1261_v50 }
 0x36a   : > { %1787 = vmatpush3.bf16.msra.mxu1 %v1261_v50 }
 0x36d   : > { %1789 = vmatmul.mubr.bf16.vlgmr.msra.gmra.mrb[32].mxu1 %v1867_v52 }
 0x36e   : > { %1792 = vmatprep.mubr.bf16.mxu1 %v1868_v53 }
 0x375   : > { %1793 = vmatmul.mubr.bf16.gmra.mrb[36].mxu1 %v1869_v54 }
 0x440   : > { %v1790_v59 = vpop.f32.mrb[32].mxu1 }
 0x441   : > { %v1385_v60 = vadd.f32 %v1790_v59, %v1291_v57  ;;  %v1376_v61 = vpop.f32.mrb[33].mxu1  ;;  %v1474_v57 = vpop.permute.xlu0 %1473 }
 0x442   : > { %v1377_v63 = vadd.f32 %v1376_v61, %v1281_v55  ;;  %v1791_v0 = vpop.f32.mrb[34].mxu1  ;;  %v1479_v61 = vpop.permute.xlu1 %1478 }
 0x443   : > { %1950 = vtanh.f32 %v1385_v60  ;;  %v1388_v1 = vadd.f32 %v1791_v0, %v1296_v58  ;;  %v1379_v2 = vpop.f32.mrb[35].mxu1 }
 0x444   : > { %1952 = vtanh.f32 %v1377_v63  ;;  %v1380_v4 = vadd.f32 %v1379_v2, %v1286_v56 }
 0x445   : > { %1954 = vtanh.f32 %v1388_v1 }
 0x446   : > { %1956 = vtanh.f32 %v1380_v4 }
 0x448   : > { %v1794_v6 = vpop.f32.mrb[36].mxu1 }
 0x449   : > { %v1401_v7 = vadd.f32 %v1794_v6, %v1311_v5  ;;  %v1392_v8 = vpop.f32.mrb[37].mxu1  ;;  %v1489_v6 = vpop.permute.xlu1 %1488 }
 0x44a   : > { %v1393_v10 = vadd.f32 %v1392_v8, %v1301_v62  ;;  %v1795_v11 = vpop.f32.mrb[38].mxu1 }
 0x44b   : > { %1958 = vtanh.f32 %v1401_v7  ;;  %v1404_v12 = vadd.f32 %v1795_v11, %v1316_v9  ;;  %v1395_v13 = vpop.f32.mrb[39].mxu1  ;;  %v1518_v9 = vlaneseq }
 0x44c   : > { %1960 = vtanh.f32 %v1393_v10  ;;  %v1396_v14 = vadd.f32 %v1395_v13, %v1306_v3  ;;  %v1484_v3 = vpop.permute.xlu0 %1483 }
 0x44d   : > { %v1951_v15 = vpop.eup %1950  ;;  %1962 = vtanh.f32 %v1404_v12  ;;  %v1519_v12 = vshrl.u32 %v1518_v9, 7 }
 0x44e   : > { %v1953_v16 = vpop.eup %1952  ;;  %v1417_v17 = vmul.f32 0.5, %v1951_v15  ;;  %1964 = vtanh.f32 %v1396_v14 }
 0x44f   : > { %v1955_v18 = vpop.eup %1954  ;;  %v1415_v19 = vmul.f32 0.5, %v1953_v16  ;;  %v1520_v15 = vsub.s32 0, %v1519_v12 }
 0x450   : > { %v1957_v20 = vpop.eup %1956  ;;  %v1418_v21 = vmul.f32 0.5, %v1955_v18  ;;  %v1425_v24 = vadd.f32 0.5, %v1417_v17  ;;  %v1516_v17 = vpop.permute.xlu0 %1515 }
 0x451   : > { %v1416_v22 = vmul.f32 0.5, %v1957_v20  ;;  %v1423_v26 = vadd.f32 0.5, %v1415_v19  ;;  %v1521_v19 = vrot.slane %v1516_v17, %v1520_v15 }
 0x452   : > { %v1426_v25 = vadd.f32 0.5, %v1418_v21 }
 0x453   : > { %v1424_v27 = vadd.f32 0.5, %v1416_v22 }
 0x454   : > { %v1432_v29 = vpack.c.bf16 %v1426_v25, %v1425_v24 }
 0x455   : > { %v1959_v30 = vpop.eup %1958  ;;  %v1431_v31 = vpack.c.bf16 %v1424_v27, %v1423_v26 }
 0x456   : > { %v1961_v32 = vpop.eup %1960  ;;  %v1421_v33 = vmul.f32 0.5, %v1959_v30  ;;  %v1437_v35 = vunpack.c.l.bf16 %v1432_v29  ;;  %v1438_v42 = vunpack.c.h.bf16 %v1432_v29 }
 0x457   : > { %v1963_v34 = vpop.eup %1962  ;;  %v1435_v36 = vunpack.c.l.bf16 %v1431_v31  ;;  %v1436_v37 = vunpack.c.h.bf16 %v1431_v31  ;;  %v1419_v38 = vmul.f32 0.5, %v1961_v32 }
 0x458   : > { %v1965_v39 = vpop.eup %1964  ;;  %v1422_v41 = vmul.f32 0.5, %v1963_v34  ;;  %v1429_v47 = vadd.f32 0.5, %v1421_v33  ;;  %v1493_v49 = vmul.f32 %v1464_v40, %v1437_v35  ;;  %v1494_v54 = vmul.f32 %v1469_v46, %v1438_v42 }
 0x459   : > { %v1491_v43 = vmul.f32 %v1454_v23, %v1435_v36  ;;  %v1492_v44 = vmul.f32 %v1459_v28, %v1436_v37  ;;  %v1420_v45 = vmul.f32 0.5, %v1965_v39  ;;  %v1427_v51 = vadd.f32 0.5, %v1419_v38 }
 0x45a   : > { %v1430_v48 = vadd.f32 0.5, %v1422_v41 }
 0x45b   : > { %v1499_v50 = vadd.f32 %v1492_v44, %v1491_v43  ;;  %v1428_v52 = vadd.f32 0.5, %v1420_v45 }
 0x45c   : > { %v1434_v53 = vpack.c.bf16 %v1430_v48, %v1429_v47 }
 0x45d   : > { %v1500_v55 = vadd.f32 %v1499_v50, %v1493_v49  ;;  %v1433_v56 = vpack.c.bf16 %v1428_v52, %v1427_v51 }
 0x45e   : > { %v1441_v62 = vunpack.c.l.bf16 %v1434_v53  ;;  %v1442_v0 = vunpack.c.h.bf16 %v1434_v53 }
 0x45f   : > { %v1439_v58 = vunpack.c.l.bf16 %v1433_v56  ;;  %v1440_v59 = vunpack.c.h.bf16 %v1433_v56  ;;  %v1501_v60 = vadd.f32 %v1500_v55, %v1494_v54 }
 0x460   : > { %v1497_v4 = vmul.f32 %v1484_v3, %v1441_v62  ;;  %v1498_v7 = vmul.f32 %v1489_v6, %v1442_v0 }
 0x461   : > { %v1495_v63 = vmul.f32 %v1474_v57, %v1439_v58  ;;  %v1496_v1 = vmul.f32 %v1479_v61, %v1440_v59 }
 0x463   : > { %v1502_v2 = vadd.f32 %v1501_v60, %v1495_v63 }
 0x465   : > { %v1503_v5 = vadd.f32 %v1502_v2, %v1496_v1 }
 0x467   : > { %v1504_v8 = vadd.f32 %v1503_v5, %v1497_v4 }
 0x469   : > { %v1505_v10 = vadd.f32 %v1504_v8, %v1498_v7 }
 0x46b   : > { %v1506_v11 = vrot.slane %v1505_v10, 4 }
 0x46d   : > { %v1507_v13 = vadd.f32 %v1506_v11, %v1505_v10 }
 0x46f   : > { %v1508_v14 = vrot.slane %v1507_v13, 2 }
 0x471   : > { %v1509_v16 = vadd.f32 %v1508_v14, %v1507_v13 }
 0x473   : > { %v1510_v18 = vrot.slane %v1509_v16, 1 }
 0x475   : > { %v1511_v20 = vadd.f32 %v1510_v18, %v1509_v16 }
 0x477   : > { %v1522_v21 = vadd.f32 %v1521_v19, %v1511_v20 }
 0x479   : > { %1966 = vtanh.f32 %v1522_v21 }
 0x483   : > { %v1967_v22 = vpop.eup %1966 }
 0x484   : > { %v1524_v23 = vmul.f32 0.5, %v1967_v22 }
 0x486   : > { %v1525_v24 = vadd.f32 0.5, %v1524_v23 }
 0x488   : > { %1526 = vst [vmem:[%s381_s16] sm:$0x1] %v1525_v24 }
 0x489   : > { %1981 = shalt.err (!%p1978_p3)
}
 0x48a   : > { %s1982_s30 = scalar_lea.hbm %s2440_s25, 16  ;;  %s1986_s15 = scalar_lea.hbm %s2493_s11, 32 }
 0x48b   : > { %p1983_p4 = scmp.ne.s32.totalorder %s2440_s25, %s1982_s30  ;;  %p1987_p9 = scmp.lt.u32.totalorder %s2440_s25, %s2493_s11 }
 0x48c   : > { %p1988_p10 = scmp.lt.u32.totalorder %s1986_s15, %s1982_s30  ;;  %p1990_p12 = scmp.lt.u32.totalorder %s1982_s30, %s2440_s25 }
 0x48d   : > { %p1984_p7 = pnand %p1983_p4, %p2132_p5 }
 0x48e   : > { %p1989_p11 = por %p1988_p10, %p1987_p9 }
 0x48f   : > { %p1985_p8 = pneg %p1984_p7 }
 0x490   : > { %p1991_p13 = por %p1990_p12, %p1989_p11 }
 0x492   : > { %p1992_p0 = pnand %p1991_p13, %p1985_p8 }
 0x494   : > { %1995 = shalt.err (!%p1992_p0)
}
 0x495   : > { %1804 = dma.vmem_to_hbm [thread:$0]  (%p2132_p5), %s2442_s10, 16, %s2440_s25, %s1528_s26  }
 0x496 PF: > { %p1810_p1 = scmp.ge.s32.totalorder %s2030_s22, 2  ;;  %s1552_s12 = sand.u32 1, %s2018_s19  }
 0x497   : > { %s1553_s14 = scalar_lea.sflag [#allocation4], %s1552_s12 }
 0x498   : > { %p1807_p2 = pnand %p1810_p1, %p2136_p6 }
 0x49a   : > { %2013 = dma.done.wait (!%p1807_p2), %s1553_s14, 16  }
 0x49b   : > { %2015 = vsyncadd (!%p1807_p2), %s1553_s14, 4294967280  ;;  %p23_p3 = scmp.ge.s32.totalorder %s2120_s24, 4   ;;  %s2496_s19 = smov %s2022_s20 }
 0x49c   : > { %s2497_s20 = smov %s2026_s21  ;;  %s2498_s21 = smov %s2130_s27 }
 0x49d   : > { %s2499_s22 = smov %s2120_s24  ;;  %25 = sbr.rel (!%p23_p3) target bundleno = 6 (0x6), region = 99 }
 0x4a4   :  { %1557 = vsyncpa [#allocation4], 1 }
 0x4a5   :  { %1559 = vsyncpa [#allocation4 + $0x1], 1 }

</bundles_post_ra>
